<compile_context>
chip_gen: v7x
topology: tpu7x:2x2x1
jax: 0.10.0
libtpu: 0.0.40
codegen_flags: <defaults>
</compile_context>

<pallas_src>
import functools

import jax
import jax.numpy as jnp
from jax.experimental import pallas as pl
from jax.experimental.pallas import tpu as pltpu


# ------------------------------------------------------------------ utilities


def _clamp(v, lo, hi):
    return int(min(max(v, lo), hi))


def _vmem_capacity_bytes():
    """Per-core VMEM capacity; conservative 64 MiB (v7x per-TC) fallback."""
    try:
        cap = int(pltpu.get_tpu_info().vmem_capacity_bytes)
        if cap > 0:
            return cap
    except Exception:
        pass
    return 64 << 20


def _maybe_buffered(block_shape, index_map, nbuf):
    """BlockSpec with deeper input pipelining when this jax supports it."""
    try:
        return pl.BlockSpec(block_shape, index_map, pipeline_mode=pl.Buffered(nbuf))
    except Exception:
        return pl.BlockSpec(block_shape, index_map)


_MAX_THW = 256 * 128  # bounds both block width and stats-kernel unroll depth


def _pick_hw_tile(C, HW, itemsize, budget_bytes):
    """HW (lane) tile for a (1, C, thw) block.

    Prefers (a) one whole-HW tile when it fits the budget, (b) a 128-multiple
    that divides HW exactly (no masked tail), (c) a 128-multiple with a cdiv
    grid and masked tail.  Never returns more than max(budget, one 128-lane
    column), so a block cannot silently blow past the VMEM limit.
    """
    if HW <= 128:
        # Lanes under-filled for HW < 128 (e.g. 7x7 feature maps).
        # TODO(synk): for HW < 128 with C >= 128 a (B, HW, C) lane-dense layout
        # (C on lanes) would avoid masked stores, but needs an HBM transpose.
        return HW
    if C * HW * itemsize <= budget_bytes and HW <= _MAX_THW:
        return HW
    max_t = (budget_bytes // (C * itemsize)) // 128 * 128
    max_t = min(max_t, _MAX_THW, pl.cdiv(HW, 128) * 128)
    max_t = max(max_t, 128)  # floor: one lane-tile wide (keeps kernel functional)
    t = max_t
    while t >= max(128, max_t // 2):
        if HW % t == 0:
            return t          # exact divisor: no masked tail
        t -= 128
    return max_t              # cdiv grid + masked tail


# ------------------------------------------------------------------- kernels


def _bn_stats_kernel(x_ref, sum_ref, sumsq_ref, *, hw, thw, lp, need_mask):
    """Per-(batch, channel) partial sum / sum-of-squares.

    Accumulators are (1, C, lp) f32, resident across the HW-tile grid axis.
    lp == 128: lane-partial accumulation (tile-aligned 128-wide slices, pure
    VALU adds, no per-tile cross-lane reduce).  lp == 1: full lane reduce
    (used when the tile width is not a multiple of 128).  The tiny final
    reduction over batch / lanes happens in plain JAX.
    """
    t = pl.program_id(1)

    @pl.when(t == 0)
    def _():
        sum_ref[...] = jnp.zeros_like(sum_ref)
        sumsq_ref[...] = jnp.zeros_like(sumsq_ref)

    if lp == 1:
        xf = x_ref[...].astype(jnp.float32)                 # (1, C, thw)
        if need_mask:
            lane = jax.lax.broadcasted_iota(jnp.int32, xf.shape, 2)
            xf = jnp.where(t * thw + lane < hw, xf, 0.0)
        sum_ref[...] += jnp.sum(xf, axis=2, keepdims=True)
        sumsq_ref[...] += jnp.sum(xf * xf, axis=2, keepdims=True)
    else:
        acc_shape = sum_ref.shape                            # (1, C, 128)
        ps = jnp.zeros(acc_shape, jnp.float32)
        pq = jnp.zeros(acc_shape, jnp.float32)
        lane = (jax.lax.broadcasted_iota(jnp.int32, acc_shape, 2)
                if need_mask else None)
        for g in range(thw // lp):                           # static, bounded unroll
            v = x_ref[:, :, pl.ds(g * lp, lp)].astype(jnp.float32)
            if need_mask:
                v = jnp.where(t * thw + g * lp + lane < hw, v, 0.0)
            ps = ps + v
            pq = pq + v * v
        sum_ref[...] += ps
        sumsq_ref[...] += pq


def _bn_apply_kernel(x_ref, scale_ref, shift_ref, o_ref):
    """y = x * scale[c] + shift[c]; math in f32, single cast at the end."""
    xf = x_ref[...].astype(jnp.float32)                      # (1, C, thw)
    o_ref[...] = (xf * scale_ref[...] + shift_ref[...]).astype(o_ref.dtype)


def _bn_fused_kernel(x_ref, gamma_ref, beta_ref, o_ref, mean_ref, var_ref, *,
                     eps, inv_count):
    """Single-pass BN for activations that fit in VMEM: one HBM read + write."""
    xf = x_ref[...].astype(jnp.float32)                      # (B, C, HW)
    xb = jnp.sum(xf, axis=0, keepdims=True)                  # (1, C, HW)
    sb = jnp.sum(xf * xf, axis=0, keepdims=True)
    mean = jnp.sum(xb, axis=2, keepdims=True) * inv_count    # (1, C, 1)
    var = jnp.sum(sb, axis=2, keepdims=True) * inv_count - mean * mean
    inv_std = jax.lax.rsqrt(var + eps)
    scale = gamma_ref[...] * inv_std                         # (1, C, 1) f32
    shift = beta_ref[...] - mean * scale
    o_ref[...] = (xf * scale + shift).astype(o_ref.dtype)
    mean_ref[...] = mean
    var_ref[...] = var


# ------------------------------------------------------------------- wrapper


def batch_norm2d(x_nchw, gamma, beta, *, eps=1e-5, momentum=0.01,
                 running_mean=None, running_var=None,
                 force_two_pass=False, tile_budget_bytes=None):
    """Training-mode BatchNorm2d forward.

    x_nchw: (B, C, H, W); gamma, beta: (C,).
    Returns y (and updated running stats when running_mean/var are given).
    `force_two_pass` / `tile_budget_bytes` are testing knobs.
    """
    B, C, H, W = x_nchw.shape
    HW = H * W
    count = B * HW
    itemsize = jnp.dtype(x_nchw.dtype).itemsize
    x = x_nchw.reshape(B, C, HW)        # free view: HW on lanes, C on sublanes

    gamma32 = gamma.astype(jnp.float32)
    beta32 = beta.astype(jnp.float32)

    # Per-generation VMEM sizing: leave headroom below physical capacity
    # (v7x: 64 MiB/TC; v5e/v6e: 128 MiB), never request it all.
    vmem_cap = _vmem_capacity_bytes()
    request_cap = _clamp(vmem_cap - (12 << 20), 16 << 20, 100 << 20)

    # -------------------- fused single-pass path (fits VMEM) -----------------
    fused_need = B * C * HW * (2 * itemsize + 8) + (2 << 20)
    if (not force_two_pass) and fused_need <= request_cap:
        fused_cost = pl.CostEstimate(
            flops=5 * B * C * HW + 10 * C, transcendentals=C,
            bytes_accessed=2 * B * C * HW * itemsize + 4 * C * 4)
        y, mean3, var3 = pl.pallas_call(
            functools.partial(_bn_fused_kernel, eps=eps, inv_count=1.0 / count),
            out_shape=(jax.ShapeDtypeStruct((B, C, HW), x_nchw.dtype),
                       jax.ShapeDtypeStruct((1, C, 1), jnp.float32),
                       jax.ShapeDtypeStruct((1, C, 1), jnp.float32)),
            grid_spec=pltpu.PrefetchScalarGridSpec(
                num_scalar_prefetch=0, grid=(1,),
                in_specs=[pl.BlockSpec((B, C, HW), lambda i: (0, 0, 0)),
                          pl.BlockSpec((1, C, 1), lambda i: (0, 0, 0)),
                          pl.BlockSpec((1, C, 1), lambda i: (0, 0, 0))],
                out_specs=(pl.BlockSpec((B, C, HW), lambda i: (0, 0, 0)),
                           pl.BlockSpec((1, C, 1), lambda i: (0, 0, 0)),
                           pl.BlockSpec((1, C, 1), lambda i: (0, 0, 0)))),
            compiler_params=pltpu.CompilerParams(
                dimension_semantics=("arbitrary",),
                vmem_limit_bytes=_clamp(fused_need + (2 << 20), 16 << 20,
                                        request_cap)),
            cost_estimate=fused_cost,
        )(x, gamma32.reshape(1, C, 1), beta32.reshape(1, C, 1))
        mean = mean3.reshape(C)
        var = var3.reshape(C)
    else:
        # ---------- pass 1: per-(batch, channel) partial sums / sumsq --------
        budget_stats = tile_budget_bytes or (request_cap // 4)  # x gets 3 buffers
        thw1 = _pick_hw_tile(C, HW, itemsize, budget_stats)
        n1 = pl.cdiv(HW, thw1)
        mask1 = (HW % thw1) != 0
        lp = 128 if thw1 % 128 == 0 else 1
        block1 = C * thw1 * itemsize
        vmem1 = _clamp(3 * block1 + 4 * C * lp * 4 + (2 << 20),
                       16 << 20, request_cap)
        stats_cost = pl.CostEstimate(
            flops=3 * B * C * HW, transcendentals=0,
            bytes_accessed=B * C * HW * itemsize + 2 * B * C * lp * 4)
        s_part, sq_part = pl.pallas_call(
            functools.partial(_bn_stats_kernel, hw=HW, thw=thw1, lp=lp,
                              need_mask=mask1),
            out_shape=(jax.ShapeDtypeStruct((B, C, lp), jnp.float32),
                       jax.ShapeDtypeStruct((B, C, lp), jnp.float32)),
            grid_spec=pltpu.PrefetchScalarGridSpec(
                num_scalar_prefetch=0, grid=(B, n1),
                in_specs=[_maybe_buffered((1, C, thw1),
                                          lambda b, t: (b, 0, t), 3)],
                out_specs=(pl.BlockSpec((1, C, lp), lambda b, t: (b, 0, 0)),
                           pl.BlockSpec((1, C, lp), lambda b, t: (b, 0, 0)))),
            compiler_params=pltpu.CompilerParams(
                dimension_semantics=("parallel", "arbitrary"),
                vmem_limit_bytes=vmem1),
            cost_estimate=stats_cost,
        )(x)

        # ---------- tiny per-channel math on (B, C, lp) partials in JAX ------
        s = jnp.sum(s_part, axis=(0, 2))
        sq = jnp.sum(sq_part, axis=(0, 2))
        mean = s / count
        var = sq / count - mean * mean           # biased batch variance
        # TODO(synk): for huge counts / large |mean| switch to a centered
        # second pass (sum of (x-mean)^2) to avoid E[x^2]-mean^2 cancellation.
        inv_std = jax.lax.rsqrt(var + eps)
        scale3 = (gamma32 * inv_std).reshape(1, C, 1)
        shift3 = (beta32 - mean * gamma32 * inv_std).reshape(1, C, 1)

        # ---------- pass 2: elementwise normalize + affine -------------------
        budget_apply = tile_budget_bytes or (request_cap // 8)  # x + y buffers
        thw2 = _pick_hw_tile(C, HW, itemsize, budget_apply)
        n2 = pl.cdiv(HW, thw2)
        block2 = C * thw2 * itemsize
        vmem2 = _clamp(4 * block2 + 2 * C * thw2 * 4 + (2 << 20),
                       16 << 20, request_cap)
        apply_cost = pl.CostEstimate(
            flops=2 * B * C * HW, transcendentals=0,
            bytes_accessed=2 * B * C * HW * itemsize + 2 * C * 4)
        y = pl.pallas_call(
            _bn_apply_kernel,
            out_shape=jax.ShapeDtypeStruct((B, C, HW), x_nchw.dtype),
            grid_spec=pltpu.PrefetchScalarGridSpec(
                num_scalar_prefetch=0, grid=(B, n2),
                in_specs=[pl.BlockSpec((1, C, thw2), lambda b, t: (b, 0, t)),
                          pl.BlockSpec((1, C, 1), lambda b, t: (0, 0, 0)),
                          pl.BlockSpec((1, C, 1), lambda b, t: (0, 0, 0))],
                out_specs=pl.BlockSpec((1, C, thw2), lambda b, t: (b, 0, t))),
            compiler_params=pltpu.CompilerParams(
                dimension_semantics=("parallel", "parallel"),
                vmem_limit_bytes=vmem2),
            cost_estimate=apply_cost,
        )(x, scale3, shift3)

    y = y.reshape(B, C, H, W)

    if running_mean is not None and running_var is not None:
        # PyTorch updates running_var with the *unbiased* batch variance.
        unbiased_var = var * (count / (count - 1)) if count > 1 else var
        new_rm = (1.0 - momentum) * running_mean + momentum * mean
        new_rv = (1.0 - momentum) * running_var + momentum * unbiased_var
        return y, new_rm, new_rv
    return y


# ----------------------------- reference -------------------------------------


def batch_norm2d_ref(x, gamma, beta, running_mean, running_var, momentum, eps):
    n = x.shape[0] * x.shape[2] * x.shape[3]
    mean = jnp.mean(x, axis=(0, 2, 3))
    var = jnp.mean((x - mean[None, :, None, None]) ** 2, axis=(0, 2, 3))
    y = (x - mean[None, :, None, None]) * jax.lax.rsqrt(var + eps)[None, :, None, None]
    y = y * gamma[None, :, None, None] + beta[None, :, None, None]
    unbiased = var * n / (n - 1)
    new_rm = (1.0 - momentum) * running_mean + momentum * mean
    new_rv = (1.0 - momentum) * running_var + momentum * unbiased
    return y, new_rm, new_rv


if __name__ == "__main__":
    eps, momentum = 1e-5, 0.01
    key = jax.random.PRNGKey(0)

    def run_case(shape, force_two_pass=False, tile_budget_bytes=None):
        B_, C_, H_, W_ = shape
        kx, kg, kb = jax.random.split(jax.random.fold_in(key, sum(shape)), 3)
        x = jax.random.normal(kx, shape, dtype=jnp.float32)
        gamma = 1.0 + 0.1 * jax.random.normal(kg, (C_,), dtype=jnp.float32)
        beta = 0.1 * jax.random.normal(kb, (C_,), dtype=jnp.float32)
        rm = jnp.zeros((C_,), jnp.float32)
        rv = jnp.ones((C_,), jnp.float32)
        y, nrm, nrv = batch_norm2d(
            x, gamma, beta, eps=eps, momentum=momentum,
            running_mean=rm, running_var=rv,
            force_two_pass=force_two_pass, tile_budget_bytes=tile_budget_bytes)
        y = jax.block_until_ready(y)
        y_ref, rm_ref, rv_ref = batch_norm2d_ref(x, gamma, beta, rm, rv,
                                                 momentum, eps)
        assert y.shape == shape
        assert jnp.allclose(y, y_ref, atol=1e-4, rtol=1e-4), f"{shape} y mismatch"
        assert jnp.allclose(nrm, rm_ref, atol=1e-5, rtol=1e-5), f"{shape} rm mismatch"
        assert jnp.allclose(nrv, rv_ref, atol=1e-4, rtol=1e-4), f"{shape} rv mismatch"

    # Main shape: fused single-pass path.
    run_case((2, 4, 16, 16))
    # Same shape through the two-pass (stats + apply) kernels.
    run_case((2, 4, 16, 16), force_two_pass=True)
    # HW not a multiple of 128 with a tiny tile budget: cdiv grid + masked tail.
    run_case((2, 8, 12, 25), force_two_pass=True, tile_budget_bytes=4096)
    # HW < 128: single under-filled tile, full lane-reduce (lp=1) path.
    run_case((2, 8, 7, 7), force_two_pass=True)

    print("KERNEL_OK")
</pallas_src>

<mosaic_0001>
module attributes {stable_mosaic.version = 11 : i64} {
  func.func @_bn_fused_kernel(%arg0: i32, %arg1: memref<2x4x256xf32, #tpu.memory_space<vmem>>, %arg2: memref<1x4x1xf32, #tpu.memory_space<vmem>>, %arg3: memref<1x4x1xf32, #tpu.memory_space<vmem>>, %arg4: memref<2x4x256xf32, #tpu.memory_space<vmem>>, %arg5: memref<1x4x1xf32, #tpu.memory_space<vmem>>, %arg6: memref<1x4x1xf32, #tpu.memory_space<vmem>>) attributes {dimension_semantics = [#tpu.dimension_semantics<arbitrary>], iteration_bounds = array<i64: 1>, scalar_prefetch = 0 : i64, scratch_operands = 0 : i64, tpu.core_type = #tpu.core_type<tc>, window_params = [{pipeline_mode = #tpu.pipeline_mode<synchronous>, transform_indices = @transform_0, window_bounds = array<i64: 2, 4, 256>}, {pipeline_mode = #tpu.pipeline_mode<synchronous>, transform_indices = @transform_1, window_bounds = array<i64: 1, 4, 1>}, {pipeline_mode = #tpu.pipeline_mode<synchronous>, transform_indices = @transform_2, window_bounds = array<i64: 1, 4, 1>}, {pipeline_mode = #tpu.pipeline_mode<synchronous>, transform_indices = @transform_3, window_bounds = array<i64: 2, 4, 256>}, {pipeline_mode = #tpu.pipeline_mode<synchronous>, transform_indices = @transform_4, window_bounds = array<i64: 1, 4, 1>}, {pipeline_mode = #tpu.pipeline_mode<synchronous>, transform_indices = @transform_5, window_bounds = array<i64: 1, 4, 1>}]} {
    %c0 = arith.constant 0 : index
    %c0_0 = arith.constant 0 : index
    %c0_1 = arith.constant 0 : index
    %0 = vector.load %arg1[%c0, %c0_0, %c0_1] : memref<2x4x256xf32, #tpu.memory_space<vmem>>, vector<2x4x256xf32>
    %cst = arith.constant dense<0.000000e+00> : vector<4x256xf32>
    %1 = vector.multi_reduction <add>, %0, %cst [0] : vector<2x4x256xf32> to vector<4x256xf32>
    %2 = vector.shape_cast %1 : vector<4x256xf32> to vector<1x4x256xf32>
    %3 = arith.mulf %0, %0 : vector<2x4x256xf32>
    %cst_2 = arith.constant dense<0.000000e+00> : vector<4x256xf32>
    %4 = vector.multi_reduction <add>, %3, %cst_2 [0] : vector<2x4x256xf32> to vector<4x256xf32>
    %5 = vector.shape_cast %4 : vector<4x256xf32> to vector<1x4x256xf32>
    %cst_3 = arith.constant dense<0.000000e+00> : vector<1x4xf32>
    %6 = vector.multi_reduction <add>, %2, %cst_3 [2] : vector<1x4x256xf32> to vector<1x4xf32>
    %7 = vector.shape_cast %6 : vector<1x4xf32> to vector<1x4x1xf32>
    %cst_4 = arith.constant 0.001953125 : f32
    %8 = vector.broadcast %cst_4 : f32 to vector<1x4x1xf32>
    %9 = arith.mulf %7, %8 : vector<1x4x1xf32>
    %cst_5 = arith.constant dense<0.000000e+00> : vector<1x4xf32>
    %10 = vector.multi_reduction <add>, %5, %cst_5 [2] : vector<1x4x256xf32> to vector<1x4xf32>
    %11 = vector.shape_cast %10 : vector<1x4xf32> to vector<1x4x1xf32>
    %cst_6 = arith.constant 0.001953125 : f32
    %12 = vector.broadcast %cst_6 : f32 to vector<1x4x1xf32>
    %13 = arith.mulf %11, %12 : vector<1x4x1xf32>
    %14 = arith.mulf %9, %9 : vector<1x4x1xf32>
    %15 = arith.subf %13, %14 : vector<1x4x1xf32>
    %cst_7 = arith.constant 9.99999974E-6 : f32
    %16 = vector.broadcast %cst_7 : f32 to vector<1x4x1xf32>
    %17 = arith.addf %15, %16 : vector<1x4x1xf32>
    %18 = math.rsqrt %17 : vector<1x4x1xf32>
    %c0_8 = arith.constant 0 : index
    %c0_9 = arith.constant 0 : index
    %c0_10 = arith.constant 0 : index
    %19 = vector.load %arg2[%c0_8, %c0_9, %c0_10] : memref<1x4x1xf32, #tpu.memory_space<vmem>>, vector<1x4x1xf32>
    %20 = arith.mulf %19, %18 : vector<1x4x1xf32>
    %c0_11 = arith.constant 0 : index
    %c0_12 = arith.constant 0 : index
    %c0_13 = arith.constant 0 : index
    %21 = vector.load %arg3[%c0_11, %c0_12, %c0_13] : memref<1x4x1xf32, #tpu.memory_space<vmem>>, vector<1x4x1xf32>
    %22 = arith.mulf %9, %20 : vector<1x4x1xf32>
    %23 = arith.subf %21, %22 : vector<1x4x1xf32>
    %24 = vector.broadcast %20 : vector<1x4x1xf32> to vector<2x4x256xf32>
    %25 = arith.mulf %0, %24 : vector<2x4x256xf32>
    %26 = vector.broadcast %23 : vector<1x4x1xf32> to vector<2x4x256xf32>
    %27 = arith.addf %25, %26 : vector<2x4x256xf32>
    %c0_14 = arith.constant 0 : index
    %c0_15 = arith.constant 0 : index
    %c0_16 = arith.constant 0 : index
    %28 = vector.load %arg4[%c0_14, %c0_15, %c0_16] : memref<2x4x256xf32, #tpu.memory_space<vmem>>, vector<2x4x256xf32>
    tpu.vector_store %arg4[%c0_14, %c0_15, %c0_16], %27 {strides = array<i32>} : memref<2x4x256xf32, #tpu.memory_space<vmem>>, vector<2x4x256xf32>,
    %c0_17 = arith.constant 0 : index
    %c0_18 = arith.constant 0 : index
    %c0_19 = arith.constant 0 : index
    %29 = vector.load %arg5[%c0_17, %c0_18, %c0_19] : memref<1x4x1xf32, #tpu.memory_space<vmem>>, vector<1x4x1xf32>
    tpu.vector_store %arg5[%c0_17, %c0_18, %c0_19], %9 {strides = array<i32>} : memref<1x4x1xf32, #tpu.memory_space<vmem>>, vector<1x4x1xf32>,
    %c0_20 = arith.constant 0 : index
    %c0_21 = arith.constant 0 : index
    %c0_22 = arith.constant 0 : index
    %30 = vector.load %arg6[%c0_20, %c0_21, %c0_22] : memref<1x4x1xf32, #tpu.memory_space<vmem>>, vector<1x4x1xf32>
    tpu.vector_store %arg6[%c0_20, %c0_21, %c0_22], %15 {strides = array<i32>} : memref<1x4x1xf32, #tpu.memory_space<vmem>>, vector<1x4x1xf32>,
    return
  }
  func.func @transform_0(%arg0: i32) -> (i32, i32, i32) {
    %c0_i32 = arith.constant 0 : i32
    %c0_i32_0 = arith.constant 0 : i32
    %c0_i32_1 = arith.constant 0 : i32
    %c0_i32_2 = arith.constant 0 : i32
    return %c0_i32, %c0_i32_0, %c0_i32_1 : i32, i32, i32
  }
  func.func @transform_1(%arg0: i32) -> (i32, i32, i32) {
    %c0_i32 = arith.constant 0 : i32
    %c0_i32_0 = arith.constant 0 : i32
    %c0_i32_1 = arith.constant 0 : i32
    %c0_i32_2 = arith.constant 0 : i32
    return %c0_i32, %c0_i32_0, %c0_i32_1 : i32, i32, i32
  }
  func.func @transform_2(%arg0: i32) -> (i32, i32, i32) {
    %c0_i32 = arith.constant 0 : i32
    %c0_i32_0 = arith.constant 0 : i32
    %c0_i32_1 = arith.constant 0 : i32
    %c0_i32_2 = arith.constant 0 : i32
    return %c0_i32, %c0_i32_0, %c0_i32_1 : i32, i32, i32
  }
  func.func @transform_3(%arg0: i32) -> (i32, i32, i32) {
    %c0_i32 = arith.constant 0 : i32
    %c0_i32_0 = arith.constant 0 : i32
    %c0_i32_1 = arith.constant 0 : i32
    %c0_i32_2 = arith.constant 0 : i32
    return %c0_i32, %c0_i32_0, %c0_i32_1 : i32, i32, i32
  }
  func.func @transform_4(%arg0: i32) -> (i32, i32, i32) {
    %c0_i32 = arith.constant 0 : i32
    %c0_i32_0 = arith.constant 0 : i32
    %c0_i32_1 = arith.constant 0 : i32
    %c0_i32_2 = arith.constant 0 : i32
    return %c0_i32, %c0_i32_0, %c0_i32_1 : i32, i32, i32
  }
  func.func @transform_5(%arg0: i32) -> (i32, i32, i32) {
    %c0_i32 = arith.constant 0 : i32
    %c0_i32_0 = arith.constant 0 : i32
    %c0_i32_1 = arith.constant 0 : i32
    %c0_i32_2 = arith.constant 0 : i32
    return %c0_i32, %c0_i32_0, %c0_i32_1 : i32, i32, i32
  }
}

</mosaic_0001>

<bundles_post_ra>
// kernel: tpu_custom_call.1
= control target key start
LH: loop header
LB: loop body
LE: loop exit
PB: predicated region body
PF: predicated region fallthrough
CT: control target
= control target key end

     0   :  { %11 = vsyncpa [#allocation3], 0  ;;  %s290_s0 = inlined_call_operand.hbm [shape: f32[2,4,256], index: 0, kind: input, shape index: {}]   ;;  %s291_s1 = inlined_call_operand.vmem [shape: f32[1,4,1], index: 1, kind: input, shape index: {}]   ;;  %s292_s2 = inlined_call_operand.vmem [shape: f32[1,4,1], index: 2, kind: input, shape index: {}]   ;;  %s293_s3 = inlined_call_operand.hbm [shape: f32[2,4,256], index: 3, kind: output, shape index: {0}]   ;;  %s294_s4 = inlined_call_operand.vmem [shape: f32[1,4,1], index: 4, kind: output, shape index: {1}]   ;;  %s295_s5 = inlined_call_operand.vmem [shape: f32[1,4,1], index: 5, kind: output, shape index: {2}]  }
   0x1   :  { %12 = vsyncpa [#allocation4], 0  ;;  %s200_s18 = smov [#allocation2]   ;;  %s152_s22 = scalar_lea.hbm %s290_s0, 256 }
   0x2   :  { %s18_s19 = sshll.u32 %s200_s18, 4  ;;  %p153_p0 = scmp.ne.s32.totalorder %s290_s0, %s152_s22  ;;  %s19_s19 = int_to_ptr.vmem [resolvable:$true] %s18_s19 }
   0x3   :  { %p156_p1 = scmp.lt.u32.totalorder %s152_s22, %s290_s0 }
   0x5   :  { %p158_p2 = pnand %p156_p1, %p153_p0 }
   0x7   :  { %161 = shalt.err (!%p158_p2)
}
   0x8   :  { %s162_s27 = scalar_lea.vmem %s19_s19, 256  ;;  %p167_p4 = scmp.lt.s32.totalorder %s19_s19, %s19_s19 }
   0x9   :  { %p163_p3 = scmp.ne.s32.totalorder %s19_s19, %s162_s27  ;;  %p168_p5 = scmp.lt.s32.totalorder %s162_s27, %s162_s27 }
   0xb   :  { %p169_p6 = por %p168_p5, %p167_p4 }
   0xd   :  { %p170_p7 = pnand %p169_p6, %p163_p3 }
   0xf   :  { %173 = shalt.err (!%p170_p7)
}
  0x10   :  { %s201_s28 = smov 128   ;;  %s202_s29 = smov 8  }
  0x11   :  { %24 = dma.hbm_to_vmem [thread:$0]  %s290_s0, 256, %s19_s19, [#allocation3], %s201_s28, %s201_s28, %s202_s29  }
  0x12   :  { %196 = dma.done.wait [#allocation3], 256  }
  0x13   :  { %197 = vsyncadd [#allocation3], 4294967040  ;;  %vm40_vm0 = vcmask 1043456   ;;  %v32_v0 = vld [vmem:[#allocation2] sm:$0xff]  ;;  %v33_v1 = vld [vmem:[#allocation2 + $0x8] sm:$0xff]  ;;  %v203_v26 = vmov 0   ;;  %v89_v42 = vlaneseq }
  0x14   :  { %v36_v2 = vcombine.high %v32_v0, %v32_v0  ;;  %v37_v3 = vcombine.high %v33_v1, %v33_v1  ;;  %v41_v4 = vsel %vm40_vm0, %v32_v0, 0.0  ;;  %v42_v5 = vsel %vm40_vm0, %v33_v1, 0.0  ;;  %146 = vset.pattern.permute.xlu1 %v203_v26  ;;  %147 = vset.pattern.permute.xlu0 %v203_v26  ;;  %v77_v34 = vld [vmem:[%s291_s1] sm:$0xf]  ;;  %s205_s1 = smov [#allocation5]  }
  0x15   :  { %v43_v6 = vadd.f32 %v42_v5, %v41_v4  ;;  %v47_v7 = vmul.f32 %v32_v0, %v32_v0  ;;  %v48_v8 = vmul.f32 %v33_v1, %v33_v1  ;;  %vm112_vm1 = vcmask 3072   ;;  %v79_v37 = vld [vmem:[%s292_s2] sm:$0xf] }
  0x16   :  { %v44_v9 = vsel %vm40_vm0, %v36_v2, 0.0  ;;  %v45_v10 = vsel %vm40_vm0, %v37_v3, 0.0  ;;  %v204_v40 = vmov 839922192   ;;  %v90_v44 = vshrl.u32 %v89_v42, 7 }
  0x17   :  { %v46_v11 = vadd.f32 %v45_v10, %v44_v9  ;;  %v61_v12 = vsel %vm40_vm0, %v43_v6, 0.0  ;;  %v51_v13 = vcombine.high %v47_v7, %v47_v7  ;;  %v52_v14 = vcombine.high %v48_v8, %v48_v8 }
  0x18   :  { %v55_v15 = vsel %vm40_vm0, %v47_v7, 0.0  ;;  %v56_v16 = vsel %vm40_vm0, %v48_v8, 0.0  ;;  %v87_v41 = vunpack.c.l.s4 %v204_v40 }
  0x19   :  { %v62_v17 = vsel %vm40_vm0, %v46_v11, 0.0  ;;  %v57_v18 = vadd.f32 %v56_v16, %v55_v15  ;;  %v58_v19 = vsel %vm40_vm0, %v51_v13, 0.0  ;;  %v59_v20 = vsel %vm40_vm0, %v52_v14, 0.0 }
  0x1a   :  { %v63_v21 = vadd.f32 %v62_v17, %v61_v12  ;;  %v60_v22 = vadd.f32 %v59_v20, %v58_v19  ;;  %v88_v43 = vunpack.c.0.s8 %v87_v41 }
  0x1b   :  { %v67_v23 = vsel %vm40_vm0, %v57_v18, 0.0 }
  0x1c   :  { %64 = vadd.xlane.f32.xlu0 %v63_v21  ;;  %v68_v24 = vsel %vm40_vm0, %v60_v22, 0.0  ;;  %v91_v45 = vsub.s32 %v88_v43, %v90_v44 }
  0x1d   :  { %v69_v25 = vadd.f32 %v68_v24, %v67_v23 }
  0x20   :  { %70 = vadd.xlane.f32.xlu0 %v69_v25 }
  0xa9   :  { %v65_v27 = vpop.xlane.xlu0 %64 }
  0xaa   :  { %v66_v28 = vmul.f32 0.001953125, %v65_v27 }
  0xac   :  { %113 = vst.msk [vmem:[%s294_s4] sm:$0xf] %vm112_vm1, %v66_v28  ;;  %v73_v30 = vmul.f32 %v66_v28, %v66_v28  ;;  %s120_s4 = sshll.u32 %s205_s1, 4  ;;  %s121_s4 = int_to_ptr.vmem [resolvable:$true] %s120_s4 }
  0xad   :  { %v71_v29 = vpop.xlane.xlu0 %70  ;;  %s174_s2 = scalar_lea.vmem %s121_s4, 256  ;;  %p179_p9 = scmp.lt.s32.totalorder %s121_s4, %s121_s4 }
  0xae   :  { %v72_v31 = vmul.f32 0.001953125, %v71_v29  ;;  %p175_p8 = scmp.ne.s32.totalorder %s121_s4, %s174_s2  ;;  %p180_p10 = scmp.lt.s32.totalorder %s174_s2, %s174_s2 }
  0xb0   :  { %v74_v32 = vsub.f32 %v72_v31, %v73_v30  ;;  %p181_p11 = por %p180_p10, %p179_p9 }
  0xb2   :  { %v75_v33 = vadd.f32 1e-05, %v74_v32  ;;  %114 = vst.msk [vmem:[%s295_s5] sm:$0xf] %vm112_vm1, %v74_v32  ;;  %p182_p12 = pnand %p181_p11, %p175_p8 }
  0xb4   :  { %150 = vrsqrt.f32 %v75_v33 }
  0xbe   :  { %v151_v35 = vpop.eup %150 }
  0xbf   :  { %v78_v36 = vmul.f32 %v151_v35, %v77_v34 }
  0xc1   :  { %84 = vperm.xlu1 %146, %v78_v36   ;;  %v80_v38 = vmul.f32 %v78_v36, %v66_v28 }
  0xc3   :  { %v81_v39 = vsub.f32 %v79_v37, %v80_v38 }
  0xc5   :  { %98 = vperm.xlu1 %146, %v81_v39  }
 0x140   :  { %v85_v46 = vpop.permute.xlu1 %84 }
 0x141   :  { %v92_v47 = vrot.slane %v85_v46, %v91_v45 }
 0x143   :  { %v94_v49 = vmul.f32 %v92_v47, %v32_v0  ;;  %v95_v50 = vmul.f32 %v92_v47, %v33_v1 }
 0x144   :  { %v99_v48 = vpop.permute.xlu1 %98 }
 0x145   :  { %v106_v51 = vrot.slane %v99_v48, %v91_v45 }
 0x147   :  { %v108_v52 = vadd.f32 %v106_v51, %v94_v49  ;;  %v109_v53 = vadd.f32 %v106_v51, %v95_v50 }
 0x149   :  { %110 = vst [vmem:[#allocation5] sm:$0xff] %v108_v52  ;;  %111 = vst [vmem:[#allocation5 + $0x8] sm:$0xff] %v109_v53 }
 0x14a   :  { %185 = shalt.err (!%p182_p12)
}
 0x14b   :  { %s186_s15 = scalar_lea.hbm %s293_s3, 256 }
 0x14c   :  { %p187_p13 = scmp.ne.s32.totalorder %s293_s3, %s186_s15  ;;  %p190_p0 = scmp.lt.u32.totalorder %s186_s15, %s293_s3 }
 0x14e   :  { %p192_p1 = pnand %p190_p0, %p187_p13 }
 0x150   :  { %195 = shalt.err (!%p192_p1)
}
 0x151   :  { %126 = dma.vmem_to_hbm [thread:$0]  %s121_s4, 256, %s293_s3, [#allocation4], %s201_s28, %s201_s28, %s202_s29  }
 0x152   :  { %198 = dma.done.wait [#allocation4], 256  }
 0x153   :  { %199 = vsyncadd [#allocation4], 4294967040 }
 0x154   :  { %138 = vsyncpa [#allocation3], 1 }
 0x155   :  { %139 = vsyncpa [#allocation4], 1 }

</bundles_post_ra>
